<compile_context>
chip_gen: v5e
topology: v5e:2x2
jax: 0.10.0
libtpu: 0.0.40
codegen_flags: <defaults>
</compile_context>

<pallas_src>
import functools

import jax
import jax.numpy as jnp
from jax.experimental import pallas as pl
from jax.experimental.pallas import tpu as pltpu


def _st_backbone_kernel(x_ref, w_ref, b_ref, o_ref, *, num_layers, nc):
    """One grid step: both branches, all layers, final branch max.

    x_ref: [rt, 2*N*C]            (branch-0 cols | branch-1 cols), both = x
    w_ref: [L, 2*N*C, 2*N*C]      blockdiag(kron(A0^T, W0_l), kron(A1^T, W1_l))
    b_ref: [L, 1, 2*N*C]          per-layer bias row (branch0 | branch1)
    o_ref: [rt, N*C]              branch-max output
    """
    h = x_ref[...]                                   # [rt, 2*NC], lane-dense
    for l in range(num_layers):                      # static unroll (L small)
        h = jnp.dot(h, w_ref[l], preferred_element_type=jnp.float32)
        h = jnp.maximum(h + b_ref[l], 0.0)           # bias + ReLU (VPU)
    # column half 0 = branch-0 output, half 1 = branch-1 output.
    o_ref[...] = jnp.maximum(h[:, :nc], h[:, nc:])


def _block_diag2(a, b):
    za = jnp.zeros((a.shape[0], b.shape[1]), a.dtype)
    zb = jnp.zeros((b.shape[0], a.shape[1]), b.dtype)
    return jnp.concatenate(
        [jnp.concatenate([a, za], axis=1),
         jnp.concatenate([zb, b], axis=1)], axis=0)


def _pick_row_tile(bt, max_tile=512):
    """Largest row tile (multiple of 8, dividing bt) up to max_tile."""
    if bt <= max_tile:
        return bt
    for rt in range(max_tile - max_tile % 8, 7, -8):
        if bt % rt == 0:
            return rt
    return bt


def st_backbone(x_bntc, adjs, weights, biases, *, num_layers):
    """x_bntc: [B, N, T, C] float32.  Returns [B, N, T, C]."""
    B, N, T, C = x_bntc.shape
    L = num_layers
    f32 = jnp.float32
    nc = N * C
    bt = B * T
    rt = _pick_row_tile(bt)
    n_steps = bt // rt

    x = x_bntc.astype(f32)
    # [B,N,T,C] -> [B*T, N*C]   rows ordered (b, t), cols ordered (n, c).
    xf = jnp.transpose(x, (0, 2, 1, 3)).reshape(bt, nc)
    # Duplicate columns so branch 0 / branch 1 evolve in separate halves.
    x2 = jnp.concatenate([xf, xf], axis=1)           # [BT, 2*NC]

    # Fused per-layer operator and bias row (precomputed in the wrapper; in a
    # real model these are functions of static weights and get hoisted).
    w_l, b_l = [], []
    for l in range(L):
        m0 = jnp.kron(adjs[0].astype(f32).T, weights[0, l].astype(f32))
        m1 = jnp.kron(adjs[1].astype(f32).T, weights[1, l].astype(f32))
        w_l.append(_block_diag2(m0, m1))             # [2NC, 2NC]
        b_l.append(jnp.concatenate(
            [jnp.tile(biases[0, l, 0].astype(f32), N),
             jnp.tile(biases[1, l, 0].astype(f32), N)]))
    w_all = jnp.stack(w_l)                           # [L, 2NC, 2NC]
    b_all = jnp.stack(b_l).reshape(L, 1, 2 * nc)     # [L, 1, 2NC]

    kernel = functools.partial(_st_backbone_kernel, num_layers=L, nc=nc)

    flops = 2 * L * bt * (2 * nc) * (2 * nc)
    bytes_accessed = 4 * (x2.size + w_all.size + b_all.size + bt * nc)

    out = pl.pallas_call(
        kernel,
        out_shape=jax.ShapeDtypeStruct((bt, nc), f32),
        grid=(n_steps,),
        in_specs=[
            pl.BlockSpec((rt, 2 * nc), lambda r: (r, 0)),
            pl.BlockSpec((L, 2 * nc, 2 * nc), lambda r: (0, 0, 0)),
            pl.BlockSpec((L, 1, 2 * nc), lambda r: (0, 0, 0)),
        ],
        out_specs=pl.BlockSpec((rt, nc), lambda r: (r, 0)),
        compiler_params=pltpu.CompilerParams(
            dimension_semantics=("parallel",)),
        cost_estimate=pl.CostEstimate(flops=int(flops), transcendentals=0,
                                      bytes_accessed=int(bytes_accessed)),
    )(x2, w_all, b_all)

    # [B*T, N*C] -> [B, N, T, C]
    return out.reshape(B, T, N, C).transpose(0, 2, 1, 3)


def st_backbone_reference(x_bntc, adjs, weights, biases, *, num_layers):
    """Pure-JAX reference mirroring the PyTorch forward semantics."""
    outs = []
    for br in range(2):
        h = x_bntc
        for l in range(num_layers):
            h = jnp.einsum("nm,bmtc->bntc", adjs[br], h)
            h = jnp.einsum("bntc,cd->bntd", h, weights[br, l])
            h = jnp.maximum(h + biases[br, l, 0], 0.0)
        outs.append(h)
    # torch.stack(..., dim=3).max(dim=3)[0]
    return jnp.maximum(outs[0], outs[1])


if __name__ == "__main__":
    # Small shapes consistent with the module: batch=2, channels=4,
    # num_nodes=16, time=8, num_layers=2, two predefined adjacencies.
    B, C, N, T = 2, 4, 16, 8
    NUM_LAYERS = 2

    key = jax.random.PRNGKey(0)
    k_x, k_a, k_w, k_b = jax.random.split(key, 4)

    # Input in PyTorch NCHW layout [B, C, N, T], then transposed for the kernel.
    x_nchw = jax.random.normal(k_x, (B, C, N, T), dtype=jnp.float32)
    x_bntc = jnp.transpose(x_nchw, (0, 2, 3, 1))          # [B, N, T, C]

    # Two predefined adjacencies: random non-negative, row-normalized.
    raw = jax.random.uniform(k_a, (2, N, N), dtype=jnp.float32) + 0.1
    adjs = raw / jnp.sum(raw, axis=-1, keepdims=True)      # [2, N, N]

    # Per-branch, per-layer channel-mix weights and biases (deterministic).
    weights = 0.5 * jax.random.normal(
        k_w, (2, NUM_LAYERS, C, C), dtype=jnp.float32)      # [2, L, C, C]
    biases = 0.1 * jax.random.normal(
        k_b, (2, NUM_LAYERS, 1, C), dtype=jnp.float32)      # [2, L, 1, C]

    out = st_backbone(x_bntc, adjs, weights, biases, num_layers=NUM_LAYERS)
    out = jax.block_until_ready(out)

    ref = st_backbone_reference(x_bntc, adjs, weights, biases,
                                num_layers=NUM_LAYERS)
    assert out.shape == (B, N, T, C)
    assert jnp.allclose(out, ref, atol=1e-5, rtol=1e-5), (
        f"max abs err {jnp.max(jnp.abs(out - ref))}")

    print("KERNEL_OK")
</pallas_src>

<mosaic_0001>
module attributes {stable_mosaic.version = 11 : i64} {
  func.func @_st_backbone_kernel(%arg0: i32, %arg1: memref<16x128xf32, #tpu.memory_space<vmem>>, %arg2: memref<2x128x128xf32, #tpu.memory_space<vmem>>, %arg3: memref<2x1x128xf32, #tpu.memory_space<vmem>>, %arg4: memref<16x64xf32, #tpu.memory_space<vmem>>) attributes {dimension_semantics = [#tpu.dimension_semantics<parallel>], iteration_bounds = array<i64: 1>, scalar_prefetch = 0 : i64, scratch_operands = 0 : i64, tpu.core_type = #tpu.core_type<tc>, window_params = [{transform_indices = @transform_0, window_bounds = array<i64: 16, 128>}, {pipeline_mode = #tpu.pipeline_mode<synchronous>, transform_indices = @transform_1, window_bounds = array<i64: 2, 128, 128>}, {pipeline_mode = #tpu.pipeline_mode<synchronous>, transform_indices = @transform_2, window_bounds = array<i64: 2, 1, 128>}, {transform_indices = @transform_3, window_bounds = array<i64: 16, 64>}]} {
    %c0 = arith.constant 0 : index
    %c0_0 = arith.constant 0 : index
    %0 = vector.load %arg1[%c0, %c0_0] : memref<16x128xf32, #tpu.memory_space<vmem>>, vector<16x128xf32>
    %c0_1 = arith.constant 0 : index
    %c0_2 = arith.constant 0 : index
    %c0_3 = arith.constant 0 : index
    %1 = vector.load %arg2[%c0_1, %c0_2, %c0_3] : memref<2x128x128xf32, #tpu.memory_space<vmem>>, vector<1x128x128xf32>
    %2 = vector.shape_cast %1 : vector<1x128x128xf32> to vector<128x128xf32>
    %cst = arith.constant dense<0.000000e+00> : vector<16x128xf32>
    %3 = tpu.matmul %0, %2, %cst {dimension_numbers = #tpu.dot_dimension_numbers<[1], [0], [0], [1], [0, 0, 1, 1], [], []>} : vector<16x128xf32>, vector<128x128xf32>, vector<16x128xf32> -> vector<16x128xf32>
    %c0_4 = arith.constant 0 : index
    %c0_5 = arith.constant 0 : index
    %c0_6 = arith.constant 0 : index
    %4 = vector.load %arg3[%c0_4, %c0_5, %c0_6] : memref<2x1x128xf32, #tpu.memory_space<vmem>>, vector<1x1x128xf32>
    %5 = vector.shape_cast %4 : vector<1x1x128xf32> to vector<1x128xf32>
    %6 = vector.broadcast %5 : vector<1x128xf32> to vector<16x128xf32>
    %7 = arith.addf %3, %6 : vector<16x128xf32>
    %cst_7 = arith.constant 0.000000e+00 : f32
    %8 = vector.broadcast %cst_7 : f32 to vector<16x128xf32>
    %9 = arith.maximumf %7, %8 : vector<16x128xf32>
    %c1 = arith.constant 1 : index
    %c0_8 = arith.constant 0 : index
    %c0_9 = arith.constant 0 : index
    %10 = vector.load %arg2[%c1, %c0_8, %c0_9] : memref<2x128x128xf32, #tpu.memory_space<vmem>>, vector<1x128x128xf32>
    %11 = vector.shape_cast %10 : vector<1x128x128xf32> to vector<128x128xf32>
    %cst_10 = arith.constant dense<0.000000e+00> : vector<16x128xf32>
    %12 = tpu.matmul %9, %11, %cst_10 {dimension_numbers = #tpu.dot_dimension_numbers<[1], [0], [0], [1], [0, 0, 1, 1], [], []>} : vector<16x128xf32>, vector<128x128xf32>, vector<16x128xf32> -> vector<16x128xf32>
    %c1_11 = arith.constant 1 : index
    %c0_12 = arith.constant 0 : index
    %c0_13 = arith.constant 0 : index
    %13 = vector.load %arg3[%c1_11, %c0_12, %c0_13] : memref<2x1x128xf32, #tpu.memory_space<vmem>>, vector<1x1x128xf32>
    %14 = vector.shape_cast %13 : vector<1x1x128xf32> to vector<1x128xf32>
    %15 = vector.broadcast %14 : vector<1x128xf32> to vector<16x128xf32>
    %16 = arith.addf %12, %15 : vector<16x128xf32>
    %cst_14 = arith.constant 0.000000e+00 : f32
    %17 = vector.broadcast %cst_14 : f32 to vector<16x128xf32>
    %18 = arith.maximumf %16, %17 : vector<16x128xf32>
    %19 = vector.extract_strided_slice %18 {offsets = [0, 0], sizes = [16, 64], strides = [1, 1]} : vector<16x128xf32> to vector<16x64xf32>
    %20 = vector.extract_strided_slice %18 {offsets = [0, 64], sizes = [16, 64], strides = [1, 1]} : vector<16x128xf32> to vector<16x64xf32>
    %21 = arith.maximumf %19, %20 : vector<16x64xf32>
    %c0_15 = arith.constant 0 : index
    %c0_16 = arith.constant 0 : index
    %22 = vector.load %arg4[%c0_15, %c0_16] : memref<16x64xf32, #tpu.memory_space<vmem>>, vector<16x64xf32>
    tpu.vector_store %arg4[%c0_15, %c0_16], %21 {strides = array<i32>} : memref<16x64xf32, #tpu.memory_space<vmem>>, vector<16x64xf32>,
    return
  }
  func.func @transform_0(%arg0: i32) -> (i32, i32) {
    %c0_i32 = arith.constant 0 : i32
    %c0_i32_0 = arith.constant 0 : i32
    return %arg0, %c0_i32 : i32, i32
  }
  func.func @transform_1(%arg0: i32) -> (i32, i32, i32) {
    %c0_i32 = arith.constant 0 : i32
    %c0_i32_0 = arith.constant 0 : i32
    %c0_i32_1 = arith.constant 0 : i32
    %c0_i32_2 = arith.constant 0 : i32
    return %c0_i32, %c0_i32_0, %c0_i32_1 : i32, i32, i32
  }
  func.func @transform_2(%arg0: i32) -> (i32, i32, i32) {
    %c0_i32 = arith.constant 0 : i32
    %c0_i32_0 = arith.constant 0 : i32
    %c0_i32_1 = arith.constant 0 : i32
    %c0_i32_2 = arith.constant 0 : i32
    return %c0_i32, %c0_i32_0, %c0_i32_1 : i32, i32, i32
  }
  func.func @transform_3(%arg0: i32) -> (i32, i32) {
    %c0_i32 = arith.constant 0 : i32
    %c0_i32_0 = arith.constant 0 : i32
    return %arg0, %c0_i32 : i32, i32
  }
}

</mosaic_0001>

<bundles_post_ra>
// kernel: tpu_custom_call.1
= control target key start
LH: loop header
LB: loop body
LE: loop exit
PB: predicated region body
PF: predicated region fallthrough
CT: control target
= control target key end

     0   :  { %8 = vsyncpa [#allocation3], 0  ;;  %s384_s0 = inlined_call_operand.hbm [shape: f32[16,128], index: 0, kind: input, shape index: {}]   ;;  %s385_s1 = inlined_call_operand.hbm [shape: f32[2,128,128], index: 1, kind: input, shape index: {}]   ;;  %s386_s2 = inlined_call_operand.hbm [shape: f32[2,1,128], index: 2, kind: input, shape index: {}]   ;;  %s387_s3 = inlined_call_operand.hbm [shape: f32[16,64], index: 3, kind: output, shape index: {}]  }
   0x1   :  { %9 = vsyncpa [#allocation6], 0 }
   0x2   :  { %10 = vsyncpa [#allocation4], 0  ;;  %s28_s14 = sshll.u32 %s385_s1, 4  ;;  %s334_s15 = smov [#allocation5]   ;;  %s29_s14 = int_to_ptr.hbm [resolvable:$true] %s28_s14 }
   0x3   :  { %s30_s16 = sshll.u32 %s334_s15, 4  ;;  %s15_s19 = sshll.u32 %s384_s0, 4  ;;  %s31_s16 = int_to_ptr.vmem [resolvable:$true] %s30_s16  ;;  %s16_s19 = int_to_ptr.hbm [resolvable:$true] %s15_s19 }
   0x4   :  { %s335_s20 = smov 128   ;;  %s336_s21 = smov 8  }
   0x5   :  { %36 = dma.hbm_to_vmem [thread:$0]  %s29_s14, 4096, %s31_s16, [#allocation6], %s335_s20, %s335_s20, %s336_s21  }
   0x6   :  { %s337_s22 = smov [#allocation2]   ;;  %s41_s1 = sshll.u32 %s386_s2, 4  ;;  %s42_s1 = int_to_ptr.hbm [resolvable:$true] %s41_s1 }
   0x7   :  { %s17_s23 = sshll.u32 %s337_s22, 4  ;;  %s338_s0 = smov [#allocation7]   ;;  %s18_s23 = int_to_ptr.vmem [resolvable:$true] %s17_s23 }
   0x8   :  { %23 = dma.hbm_to_vmem [thread:$0]  %s16_s19, 256, %s18_s23, [#allocation3], %s335_s20, %s335_s20, %s336_s21  }
   0x9   :  { %s43_s26 = sshll.u32 %s338_s0, 4  ;;  %s339_s27 = smov 16   ;;  %s44_s26 = int_to_ptr.vmem [resolvable:$true] %s43_s26 }
   0xa   :  { %s340_s28 = smov 1  }
   0xb   :  { %49 = dma.hbm_to_vmem [thread:$0]  %s42_s1, 32, %s44_s26, [#allocation6], %s339_s27, %s339_s27, %s340_s28  }
   0xc   :  { %328 = dma.done.wait [#allocation3], 256  }
   0xd   :  { %329 = vsyncadd [#allocation3], 4294967040 }
   0xe   :  { %330 = dma.done.wait [#allocation6], 4128  }
   0xf   :  { %331 = vsyncadd [#allocation6], 4294963168  ;;  %v79_v0 = vld [vmem:[#allocation5 + $0x78] sm:$0xff]  ;;  %v78_v1 = vld [vmem:[#allocation5 + $0x70] sm:$0xff]  ;;  %s341_s2 = smov 64   ;;  %vm166_vm0 = vcmask 523264  }
  0x10   :  { %84 = vmatpush.msra.mxu0 %v79_v0  ;;  %189 = vmatpush.msra.mxu2 %v79_v0  ;;  %v77_v2 = vld [vmem:[#allocation5 + $0x68] sm:$0xff]  ;;  %v76_v3 = vld [vmem:[#allocation5 + $0x60] sm:$0xff]  ;;  %v75_v4 = vld [vmem:[#allocation5 + $0x58] sm:$0xff]  ;;  %s342_s29 = smov [#allocation8]   ;;  %s175_s6 = sshll.u32 %s387_s3, 4  ;;  %s176_s6 = int_to_ptr.hbm [resolvable:$true] %s175_s6 }
  0x11   :  { %v125_v5 = vld [vmem:[#allocation5 + $0xf8] sm:$0xff]  ;;  %v124_v6 = vld [vmem:[#allocation5 + $0xf0] sm:$0xff]  ;;  %v123_v8 = vld [vmem:[#allocation5 + $0xe8] sm:$0xff]  ;;  %s173_s30 = sshll.u32 %s342_s29, 4  ;;  %s174_s30 = int_to_ptr.vmem [resolvable:$true] %s173_s30 }
  0x12   :  { %85 = vmatpush.msra.mxu0 %v78_v1  ;;  %190 = vmatpush.msra.mxu2 %v78_v1  ;;  %v74_v7 = vld [vmem:[#allocation5 + $0x50] sm:$0xff]  ;;  %v73_v9 = vld [vmem:[#allocation5 + $0x48] sm:$0xff]  ;;  %v122_v10 = vld [vmem:[#allocation5 + $0xe0] sm:$0xff] }
  0x13   :  { %131 = vmatpush.msra.mxu1 %v125_v5  ;;  %205 = vmatpush.msra.mxu3 %v125_v5  ;;  %v72_v11 = vld [vmem:[#allocation5 + $0x40] sm:$0xff]  ;;  %v121_v12 = vld [vmem:[#allocation5 + $0xd8] sm:$0xff]  ;;  %v120_v14 = vld [vmem:[#allocation5 + $0xd0] sm:$0xff] }
  0x14   :  { %86 = vmatpush.msra.mxu0 %v77_v2  ;;  %191 = vmatpush.msra.mxu2 %v77_v2  ;;  %v71_v13 = vld [vmem:[#allocation5 + $0x38] sm:$0xff]  ;;  %v70_v15 = vld [vmem:[#allocation5 + $0x30] sm:$0xff]  ;;  %v119_v16 = vld [vmem:[#allocation5 + $0xc8] sm:$0xff] }
  0x15   :  { %132 = vmatpush.msra.mxu1 %v124_v6  ;;  %206 = vmatpush.msra.mxu3 %v124_v6  ;;  %v69_v17 = vld [vmem:[#allocation5 + $0x28] sm:$0xff]  ;;  %v118_v18 = vld [vmem:[#allocation5 + $0xc0] sm:$0xff]  ;;  %v117_v20 = vld [vmem:[#allocation5 + $0xb8] sm:$0xff] }
  0x16   :  { %87 = vmatpush.msra.mxu0 %v76_v3  ;;  %192 = vmatpush.msra.mxu2 %v76_v3  ;;  %v68_v19 = vld [vmem:[#allocation5 + $0x20] sm:$0xff]  ;;  %v67_v21 = vld [vmem:[#allocation5 + $0x18] sm:$0xff]  ;;  %v116_v22 = vld [vmem:[#allocation5 + $0xb0] sm:$0xff] }
  0x17   :  { %133 = vmatpush.msra.mxu1 %v123_v8  ;;  %207 = vmatpush.msra.mxu3 %v123_v8  ;;  %v66_v23 = vld [vmem:[#allocation5 + $0x10] sm:$0xff]  ;;  %v115_v24 = vld [vmem:[#allocation5 + $0xa8] sm:$0xff]  ;;  %v114_v26 = vld [vmem:[#allocation5 + $0xa0] sm:$0xff] }
  0x18   :  { %88 = vmatpush.msra.mxu0 %v75_v4  ;;  %193 = vmatpush.msra.mxu2 %v75_v4  ;;  %v65_v25 = vld [vmem:[#allocation5 + $0x8] sm:$0xff]  ;;  %v64_v27 = vld [vmem:[#allocation5] sm:$0xff]  ;;  %v62_v28 = vld [vmem:[#allocation2] sm:$0xff] }
  0x19   :  { %134 = vmatpush.msra.mxu1 %v122_v10  ;;  %208 = vmatpush.msra.mxu3 %v122_v10  ;;  %v63_v29 = vld [vmem:[#allocation2 + $0x8] sm:$0xff]  ;;  %v112_v31 = vld [vmem:[#allocation5 + $0x90] sm:$0xff]  ;;  %v111_v32 = vld [vmem:[#allocation5 + $0x88] sm:$0xff] }
  0x1a   :  { %89 = vmatpush.msra.mxu0 %v74_v7  ;;  %194 = vmatpush.msra.mxu2 %v74_v7  ;;  %v113_v30 = vld [vmem:[#allocation5 + $0x98] sm:$0xff]  ;;  %v110_v33 = vld [vmem:[#allocation5 + $0x80] sm:$0xff] }
  0x1b   :  { %135 = vmatpush.msra.mxu1 %v121_v12  ;;  %209 = vmatpush.msra.mxu3 %v121_v12  ;;  %v230_v34 = vld [vmem:[#allocation7] ss:$0 sm:$0xff]  ;;  %v231_v41 = vld [vmem:[#allocation7 + $0x1] ss:$0 sm:$0xff] }
  0x1c   :  { %90 = vmatpush.msra.mxu0 %v73_v9  ;;  %195 = vmatpush.msra.mxu2 %v73_v9 }
  0x1d   :  { %136 = vmatpush.msra.mxu1 %v120_v14  ;;  %210 = vmatpush.msra.mxu3 %v120_v14 }
  0x1e   :  { %91 = vmatpush.msra.mxu0 %v72_v11  ;;  %196 = vmatpush.msra.mxu2 %v72_v11 }
  0x1f   :  { %137 = vmatpush.msra.mxu1 %v119_v16  ;;  %211 = vmatpush.msra.mxu3 %v119_v16 }
  0x20   :  { %92 = vmatpush.msra.mxu0 %v71_v13  ;;  %197 = vmatpush.msra.mxu2 %v71_v13 }
  0x21   :  { %138 = vmatpush.msra.mxu1 %v118_v18  ;;  %212 = vmatpush.msra.mxu3 %v118_v18 }
  0x22   :  { %93 = vmatpush.msra.mxu0 %v70_v15  ;;  %198 = vmatpush.msra.mxu2 %v70_v15 }
  0x23   :  { %139 = vmatpush.msra.mxu1 %v117_v20  ;;  %213 = vmatpush.msra.mxu3 %v117_v20 }
  0x24   :  { %94 = vmatpush.msra.mxu0 %v69_v17  ;;  %199 = vmatpush.msra.mxu2 %v69_v17 }
  0x25   :  { %140 = vmatpush.msra.mxu1 %v116_v22  ;;  %214 = vmatpush.msra.mxu3 %v116_v22 }
  0x26   :  { %95 = vmatpush.msra.mxu0 %v68_v19  ;;  %200 = vmatpush.msra.mxu2 %v68_v19 }
  0x27   :  { %141 = vmatpush.msra.mxu1 %v115_v24  ;;  %215 = vmatpush.msra.mxu3 %v115_v24 }
  0x28   :  { %96 = vmatpush.msra.mxu0 %v67_v21  ;;  %201 = vmatpush.msra.mxu2 %v67_v21 }
  0x29   :  { %142 = vmatpush.msra.mxu1 %v114_v26  ;;  %216 = vmatpush.msra.mxu3 %v114_v26 }
  0x2a   :  { %97 = vmatpush.msra.mxu0 %v66_v23  ;;  %202 = vmatpush.msra.mxu2 %v66_v23 }
  0x2b   :  { %143 = vmatpush.msra.mxu1 %v113_v30  ;;  %217 = vmatpush.msra.mxu3 %v113_v30 }
  0x2c   :  { %98 = vmatpush.msra.mxu0 %v65_v25  ;;  %203 = vmatpush.msra.mxu2 %v65_v25 }
  0x2d   :  { %144 = vmatpush.msra.mxu1 %v112_v31  ;;  %218 = vmatpush.msra.mxu3 %v112_v31 }
  0x2e   :  { %99 = vmatpush.msra.mxu0 %v64_v27  ;;  %204 = vmatpush.msra.mxu2 %v64_v27 }
  0x2f   :  { %100 = vmatmul.f32.vlgmr.msra.gmra.mxu0 %v62_v28  ;;  %103 = vmatmul.f32.vlgmr.msra.gmra.mxu2 %v63_v29 }
  0x30   :  { %145 = vmatpush.msra.mxu1 %v111_v32  ;;  %219 = vmatpush.msra.mxu3 %v111_v32 }
  0x32   :  { %146 = vmatpush.msra.mxu1 %v110_v33  ;;  %220 = vmatpush.msra.mxu3 %v110_v33 }
  0xac   :  { %v101_v35 = vpop.f32.mrf.mxu0 }
  0xad   :  { %v102_v36 = vadd.f32 %v230_v34, %v101_v35 }
  0xaf   :  { %v107_v37 = vmax.f32 %v102_v36, 0.0 }
  0xb1   :  { %147 = vmatmul.f32.vlgmr.msra.gmra.mxu1 %v107_v37 }
  0xb2   :  { %v104_v38 = vpop.f32.mrf.mxu2 }
  0xb3   :  { %v105_v39 = vadd.f32 %v230_v34, %v104_v38 }
  0xb5   :  { %v108_v40 = vmax.f32 %v105_v39, 0.0 }
  0xb7   :  { %150 = vmatmul.f32.vlgmr.msra.gmra.mxu3 %v108_v40 }
 0x12e   :  { %v148_v42 = vpop.f32.mrf.mxu1 }
 0x12f   :  { %v149_v43 = vadd.f32 %v231_v41, %v148_v42 }
 0x131   :  { %v154_v44 = vmax.f32 %v149_v43, 0.0 }
 0x133   :  { %158 = vrot.lane.b32.xlu0 %v154_v44, %s341_s2 }
 0x13a   :  { %v151_v45 = vpop.f32.mrf.mxu3 }
 0x13b   :  { %v152_v46 = vadd.f32 %v231_v41, %v151_v45 }
 0x13d   :  { %v155_v47 = vmax.f32 %v152_v46, 0.0 }
 0x13f   :  { %160 = vrot.lane.b32.xlu0 %v155_v47, %s341_s2 }
 0x1a5   :  { %v159_v48 = vpop.permute.xlu0 %158 }
 0x1a6   :  { %v164_v49 = vmax.f32 %v154_v44, %v159_v48 }
 0x1a8   :  { %167 = vst.msk [vmem:[#allocation8] sm:$0xff] %vm166_vm0, %v164_v49 }
 0x1b1   :  { %v161_v50 = vpop.permute.xlu0 %160 }
 0x1b2   :  { %v165_v51 = vmax.f32 %v155_v47, %v161_v50 }
 0x1b4   :  { %168 = vst.msk [vmem:[#allocation8 + $0x8] sm:$0xff] %vm166_vm0, %v165_v51 }
 0x1b5   :  { %181 = dma.vmem_to_hbm [thread:$0]  %s174_s30, 256, %s176_s6, [#allocation4], %s335_s20, %s335_s20, %s336_s21  }
 0x1b6   :  { %332 = dma.done.wait [#allocation4], 256  }
 0x1b7   :  { %333 = vsyncadd [#allocation4], 4294967040 }
 0x1b8   :  { %186 = vsyncpa [#allocation3], 1 }
 0x1b9   :  { %187 = vsyncpa [#allocation6], 1 }
 0x1ba   :  { %188 = vsyncpa [#allocation4], 1 }

</bundles_post_ra>
